<compile_context>
chip_gen: v7x
topology: tpu7x:2x2x1
jax: 0.10.0
libtpu: 0.0.40
codegen_flags: <defaults>
</compile_context>

<pallas_src>
import jax
import jax.numpy as jnp
from jax.experimental import pallas as pl
from jax.experimental.pallas import tpu as pltpu

# ----------------------- config (small synthetic shapes) -----------------------
MAX_NODES = 8          # max tree nodes (binary-heap indexed)
ATTR_DIM = 5           # per-node attribute width of the raw state tensor
F_PAD = 8              # node-feature dim padded to a sublane multiple
N_FEATURES = 5         # output_dim of FeatureSelectionHead (number of dataset features)
OUT_PAD = 8            # output dim padded for a lane-regular store
HIDDEN = 32            # backbone hidden dim (= input_dim of the head MLP)
MLP_HIDDEN = 64        # FeatureSelectionHead hidden_dim (default 64)

NEG_SLOPE = 0.01       # torch.nn.LeakyReLU default

# Row offsets inside the packed weight slab (all multiples of 8).
R_W1 = 0                       # (F_PAD,      HIDDEN)
R_W2 = R_W1 + F_PAD            # (HIDDEN,     HIDDEN)
R_W3 = R_W2 + HIDDEN           # (HIDDEN,     HIDDEN)
R_WM1 = R_W3 + HIDDEN          # (HIDDEN,     MLP_HIDDEN)
R_WM2 = R_WM1 + HIDDEN         # (MLP_HIDDEN, OUT_PAD)
R_TOTAL = R_WM2 + MLP_HIDDEN   # 168
SLAB_W = MLP_HIDDEN            # 64-wide slab (widest weight)


# ----------------------------- Pallas kernel -----------------------------------
def _lrelu(v):
    return jnp.where(v > 0, v, NEG_SLOPE * v)


def _gcn(a, h, w, b):
    # GCNConv: out = A_hat @ (h @ W) + b
    hw = jnp.dot(h, w, preferred_element_type=jnp.float32)
    return jnp.dot(a, hw, preferred_element_type=jnp.float32) + b


def fsel_head_kernel(x_ref, a_ref, p_ref, w_ref, b_ref, out_ref):
    x = x_ref[...]        # (B*N, F_PAD)   flattened, zero-padded node features
    a = a_ref[...]        # (B*N, B*N)     block-diagonal normalized adjacency
    pmat = p_ref[...]     # (B,   B*N)     existence-masked global_add_pool matrix

    # Static sub-slices of the packed parameter slabs (free).
    w1 = w_ref[R_W1:R_W1 + F_PAD, 0:HIDDEN]
    w2 = w_ref[R_W2:R_W2 + HIDDEN, 0:HIDDEN]
    w3 = w_ref[R_W3:R_W3 + HIDDEN, 0:HIDDEN]
    wm1 = w_ref[R_WM1:R_WM1 + HIDDEN, 0:MLP_HIDDEN]
    wm2 = w_ref[R_WM2:R_WM2 + MLP_HIDDEN, 0:OUT_PAD]
    b1 = b_ref[0:1, 0:HIDDEN]
    b2 = b_ref[1:2, 0:HIDDEN]
    b3 = b_ref[2:3, 0:HIDDEN]
    bm1 = b_ref[3:4, 0:MLP_HIDDEN]
    bm2 = b_ref[4:5, 0:OUT_PAD]

    # Backbone: 3 x (GCNConv + LeakyReLU) over the whole batch at once.
    h = _lrelu(_gcn(a, x, w1, b1))
    h = _lrelu(_gcn(a, h, w2, b2))
    h = _lrelu(_gcn(a, h, w3, b3))

    # global_add_pool as a matmul (only existing nodes have weight 1).
    pooled = jnp.dot(pmat, h, preferred_element_type=jnp.float32)        # (B, HIDDEN)

    # Head MLP: Linear -> LeakyReLU -> Linear.
    z = _lrelu(jnp.dot(pooled, wm1, preferred_element_type=jnp.float32) + bm1)
    out_ref[...] = jnp.dot(z, wm2, preferred_element_type=jnp.float32) + bm2


def run_fsel_head(x_flat, a_bd, pool, w_slab, b_slab):
    B = pool.shape[0]

    def full2d(arr):
        return pl.BlockSpec(arr.shape, lambda i: (0, 0))

    return pl.pallas_call(
        fsel_head_kernel,
        grid=(1,),
        in_specs=[full2d(x_flat), full2d(a_bd), full2d(pool),
                  full2d(w_slab), full2d(b_slab)],
        out_specs=pl.BlockSpec((B, OUT_PAD), lambda i: (0, 0)),
        out_shape=jax.ShapeDtypeStruct((B, OUT_PAD), jnp.float32),
        compiler_params=pltpu.CompilerParams(dimension_semantics=("arbitrary",)),
    )(x_flat, a_bd, pool, w_slab, b_slab)


# ------------------------------ JAX glue ----------------------------------------
def state_to_dense_graph(states):
    """states: (B, MAX_NODES + 1, ATTR_DIM); last row is env metadata (ignored here)."""
    # TODO(synk): Tree.state2pyg's exact node featurization is not available; the raw
    # per-node attribute rows are used directly as GCN node features.
    node_attrs = states[:, :MAX_NODES, :]                    # (B, N, F)
    exists = node_attrs[:, :, 0] >= 0.0                      # (B, N) node present?
    x_nodes = jnp.where(exists[:, :, None], node_attrs, 0.0).astype(jnp.float32)

    idx = jnp.arange(MAX_NODES)
    parent = jnp.where(idx > 0, (idx - 1) // 2, 0)           # binary-heap parent
    child_ok = exists & exists[:, parent] & (idx > 0)[None, :]
    onehot_parent = jax.nn.one_hot(parent, MAX_NODES, dtype=jnp.float32)  # (N, N)
    adj = child_ok.astype(jnp.float32)[:, :, None] * onehot_parent[None]  # child -> parent
    adj = adj + jnp.swapaxes(adj, 1, 2)                      # undirected
    self_loops = jnp.eye(MAX_NODES, dtype=jnp.float32)[None] * exists[:, :, None]
    a_tilde = adj + self_loops
    deg = a_tilde.sum(-1)
    dinv = jnp.where(deg > 0, jax.lax.rsqrt(jnp.maximum(deg, 1e-12)), 0.0)
    a_hat = dinv[:, :, None] * a_tilde * dinv[:, None, :]    # (B, N, N)
    return x_nodes, a_hat, exists


def feature_selection_head_forward(states, w_slab, b_slab):
    x_nodes, a_hat, exists = state_to_dense_graph(states)
    B, N, F = x_nodes.shape

    # Flatten batch of graphs into one big graph (block-diagonal adjacency).
    x_pad = jnp.pad(x_nodes, ((0, 0), (0, 0), (0, F_PAD - F)))
    x_flat = x_pad.reshape(B * N, F_PAD)

    eye_b = jnp.eye(B, dtype=jnp.float32)
    a_bd = jnp.einsum("bij,bc->bicj", a_hat, eye_b).reshape(B * N, B * N)

    # global_add_pool matrix: pool[b, c*N + j] = (b == c) * exists[c, j]
    pool = (eye_b[:, :, None] * exists[None].astype(jnp.float32)).reshape(B, B * N)

    out = run_fsel_head(x_flat, a_bd, pool, w_slab, b_slab)  # (B, OUT_PAD)
    return out[:, :N_FEATURES]                               # (B, N_FEATURES)


# ------------------------------ parameters --------------------------------------
def make_param_slabs(key):
    """Pack backbone GCN weights + head MLP weights into one weight slab + one bias slab."""
    keys = jax.random.split(key, 10)

    def glorot(k, fi, fo):
        lim = (6.0 / (fi + fo)) ** 0.5
        return jax.random.uniform(k, (fi, fo), jnp.float32, -lim, lim)

    def bias(k, fi, fo):
        lim = 1.0 / (fi ** 0.5)
        return jax.random.uniform(k, (fo,), jnp.float32, -lim, lim)

    w1 = glorot(keys[0], ATTR_DIM, HIDDEN)
    w2 = glorot(keys[1], HIDDEN, HIDDEN)
    w3 = glorot(keys[2], HIDDEN, HIDDEN)
    wm1 = glorot(keys[3], HIDDEN, MLP_HIDDEN)
    wm2 = glorot(keys[4], MLP_HIDDEN, N_FEATURES)
    b1 = bias(keys[5], ATTR_DIM, HIDDEN)
    b2 = bias(keys[6], HIDDEN, HIDDEN)
    b3 = bias(keys[7], HIDDEN, HIDDEN)
    bm1 = bias(keys[8], HIDDEN, MLP_HIDDEN)
    bm2 = bias(keys[9], MLP_HIDDEN, N_FEATURES)

    w_slab = jnp.zeros((R_TOTAL, SLAB_W), jnp.float32)
    w_slab = w_slab.at[R_W1:R_W1 + ATTR_DIM, :HIDDEN].set(w1)       # padded rows stay 0
    w_slab = w_slab.at[R_W2:R_W2 + HIDDEN, :HIDDEN].set(w2)
    w_slab = w_slab.at[R_W3:R_W3 + HIDDEN, :HIDDEN].set(w3)
    w_slab = w_slab.at[R_WM1:R_WM1 + HIDDEN, :MLP_HIDDEN].set(wm1)
    w_slab = w_slab.at[R_WM2:R_WM2 + MLP_HIDDEN, :N_FEATURES].set(wm2)  # padded cols 0

    b_slab = jnp.zeros((8, SLAB_W), jnp.float32)
    b_slab = b_slab.at[0, :HIDDEN].set(b1)
    b_slab = b_slab.at[1, :HIDDEN].set(b2)
    b_slab = b_slab.at[2, :HIDDEN].set(b3)
    b_slab = b_slab.at[3, :MLP_HIDDEN].set(bm1)
    b_slab = b_slab.at[4, :N_FEATURES].set(bm2)                     # padded cols 0
    return w_slab, b_slab


# ------------------------------ main ---------------------------------------------
if __name__ == "__main__":
    key = jax.random.PRNGKey(0)
    k_attr, k_params = jax.random.split(key)

    B = 4
    # deterministic states: graph b has (2b+1) existing nodes
    attrs = jax.random.uniform(k_attr, (B, MAX_NODES, ATTR_DIM), jnp.float32)
    n_nodes = jnp.array([1, 3, 5, 7])
    node_exists = jnp.arange(MAX_NODES)[None, :] < n_nodes[:, None]
    states = jnp.full((B, MAX_NODES + 1, ATTR_DIM), -1.0, jnp.float32)
    states = states.at[:, :MAX_NODES, :].set(
        jnp.where(node_exists[:, :, None], attrs, -1.0))

    w_slab, b_slab = make_param_slabs(k_params)

    fwd = jax.jit(feature_selection_head_forward)
    logits = fwd(states, w_slab, b_slab)
    jax.block_until_ready(logits)
    assert logits.shape == (B, N_FEATURES)
    assert bool(jnp.all(jnp.isfinite(logits)))
    print("KERNEL_OK")
</pallas_src>

<mosaic_0001>
module attributes {stable_mosaic.version = 11 : i64} {
  func.func @fsel_head_kernel(%arg0: i32, %arg1: memref<32x8xf32, #tpu.memory_space<vmem>>, %arg2: memref<32x32xf32, #tpu.memory_space<vmem>>, %arg3: memref<4x32xf32, #tpu.memory_space<vmem>>, %arg4: memref<168x64xf32, #tpu.memory_space<vmem>>, %arg5: memref<8x64xf32, #tpu.memory_space<vmem>>, %arg6: memref<4x8xf32, #tpu.memory_space<vmem>>) attributes {dimension_semantics = [#tpu.dimension_semantics<arbitrary>], iteration_bounds = array<i64: 1>, scalar_prefetch = 0 : i64, scratch_operands = 0 : i64, tpu.core_type = #tpu.core_type<tc>, window_params = [{pipeline_mode = #tpu.pipeline_mode<synchronous>, transform_indices = @transform_0, window_bounds = array<i64: 32, 8>}, {pipeline_mode = #tpu.pipeline_mode<synchronous>, transform_indices = @transform_1, window_bounds = array<i64: 32, 32>}, {pipeline_mode = #tpu.pipeline_mode<synchronous>, transform_indices = @transform_2, window_bounds = array<i64: 4, 32>}, {pipeline_mode = #tpu.pipeline_mode<synchronous>, transform_indices = @transform_3, window_bounds = array<i64: 168, 64>}, {pipeline_mode = #tpu.pipeline_mode<synchronous>, transform_indices = @transform_4, window_bounds = array<i64: 8, 64>}, {pipeline_mode = #tpu.pipeline_mode<synchronous>, transform_indices = @transform_5, window_bounds = array<i64: 4, 8>}]} {
    %c0 = arith.constant 0 : index
    %c0_0 = arith.constant 0 : index
    %0 = vector.load %arg1[%c0, %c0_0] : memref<32x8xf32, #tpu.memory_space<vmem>>, vector<32x8xf32>
    %c0_1 = arith.constant 0 : index
    %c0_2 = arith.constant 0 : index
    %1 = vector.load %arg2[%c0_1, %c0_2] : memref<32x32xf32, #tpu.memory_space<vmem>>, vector<32x32xf32>
    %c0_3 = arith.constant 0 : index
    %c0_4 = arith.constant 0 : index
    %2 = vector.load %arg3[%c0_3, %c0_4] : memref<4x32xf32, #tpu.memory_space<vmem>>, vector<4x32xf32>
    %c0_5 = arith.constant 0 : index
    %c0_6 = arith.constant 0 : index
    %3 = vector.load %arg4[%c0_5, %c0_6] : memref<168x64xf32, #tpu.memory_space<vmem>>, vector<8x32xf32>
    %c8 = arith.constant 8 : index
    %c0_7 = arith.constant 0 : index
    %4 = vector.load %arg4[%c8, %c0_7] : memref<168x64xf32, #tpu.memory_space<vmem>>, vector<32x32xf32>
    %c40 = arith.constant 40 : index
    %c0_8 = arith.constant 0 : index
    %5 = vector.load %arg4[%c40, %c0_8] : memref<168x64xf32, #tpu.memory_space<vmem>>, vector<32x32xf32>
    %c72 = arith.constant 72 : index
    %c0_9 = arith.constant 0 : index
    %6 = vector.load %arg4[%c72, %c0_9] : memref<168x64xf32, #tpu.memory_space<vmem>>, vector<32x64xf32>
    %c104 = arith.constant 104 : index
    %c0_10 = arith.constant 0 : index
    %7 = vector.load %arg4[%c104, %c0_10] : memref<168x64xf32, #tpu.memory_space<vmem>>, vector<64x8xf32>
    %c0_11 = arith.constant 0 : index
    %c0_12 = arith.constant 0 : index
    %8 = vector.load %arg5[%c0_11, %c0_12] : memref<8x64xf32, #tpu.memory_space<vmem>>, vector<1x32xf32>
    %c1 = arith.constant 1 : index
    %c0_13 = arith.constant 0 : index
    %9 = vector.load %arg5[%c1, %c0_13] : memref<8x64xf32, #tpu.memory_space<vmem>>, vector<1x32xf32>
    %c2 = arith.constant 2 : index
    %c0_14 = arith.constant 0 : index
    %10 = vector.load %arg5[%c2, %c0_14] : memref<8x64xf32, #tpu.memory_space<vmem>>, vector<1x32xf32>
    %c3 = arith.constant 3 : index
    %c0_15 = arith.constant 0 : index
    %11 = vector.load %arg5[%c3, %c0_15] : memref<8x64xf32, #tpu.memory_space<vmem>>, vector<1x64xf32>
    %c4 = arith.constant 4 : index
    %c0_16 = arith.constant 0 : index
    %12 = vector.load %arg5[%c4, %c0_16] : memref<8x64xf32, #tpu.memory_space<vmem>>, vector<1x8xf32>
    %cst = arith.constant dense<0.000000e+00> : vector<32x32xf32>
    %13 = tpu.matmul %0, %3, %cst {dimension_numbers = #tpu.dot_dimension_numbers<[1], [0], [0], [1], [0, 0, 1, 1], [], []>} : vector<32x8xf32>, vector<8x32xf32>, vector<32x32xf32> -> vector<32x32xf32>
    %cst_17 = arith.constant dense<0.000000e+00> : vector<32x32xf32>
    %14 = tpu.matmul %1, %13, %cst_17 {dimension_numbers = #tpu.dot_dimension_numbers<[1], [0], [0], [1], [0, 0, 1, 1], [], []>} : vector<32x32xf32>, vector<32x32xf32>, vector<32x32xf32> -> vector<32x32xf32>
    %15 = vector.broadcast %8 : vector<1x32xf32> to vector<32x32xf32>
    %16 = arith.addf %14, %15 : vector<32x32xf32>
    %cst_18 = arith.constant 0.000000e+00 : f32
    %17 = vector.broadcast %cst_18 : f32 to vector<32x32xf32>
    %18 = arith.cmpf ogt, %16, %17 : vector<32x32xf32>
    %cst_19 = arith.constant 0.00999999977 : f32
    %19 = vector.broadcast %cst_19 : f32 to vector<32x32xf32>
    %20 = arith.mulf %19, %16 : vector<32x32xf32>
    %21 = arith.select %18, %16, %20 : vector<32x32xi1>, vector<32x32xf32>
    %cst_20 = arith.constant dense<0.000000e+00> : vector<32x32xf32>
    %22 = tpu.matmul %21, %4, %cst_20 {dimension_numbers = #tpu.dot_dimension_numbers<[1], [0], [0], [1], [0, 0, 1, 1], [], []>} : vector<32x32xf32>, vector<32x32xf32>, vector<32x32xf32> -> vector<32x32xf32>
    %cst_21 = arith.constant dense<0.000000e+00> : vector<32x32xf32>
    %23 = tpu.matmul %1, %22, %cst_21 {dimension_numbers = #tpu.dot_dimension_numbers<[1], [0], [0], [1], [0, 0, 1, 1], [], []>} : vector<32x32xf32>, vector<32x32xf32>, vector<32x32xf32> -> vector<32x32xf32>
    %24 = vector.broadcast %9 : vector<1x32xf32> to vector<32x32xf32>
    %25 = arith.addf %23, %24 : vector<32x32xf32>
    %cst_22 = arith.constant 0.000000e+00 : f32
    %26 = vector.broadcast %cst_22 : f32 to vector<32x32xf32>
    %27 = arith.cmpf ogt, %25, %26 : vector<32x32xf32>
    %cst_23 = arith.constant 0.00999999977 : f32
    %28 = vector.broadcast %cst_23 : f32 to vector<32x32xf32>
    %29 = arith.mulf %28, %25 : vector<32x32xf32>
    %30 = arith.select %27, %25, %29 : vector<32x32xi1>, vector<32x32xf32>
    %cst_24 = arith.constant dense<0.000000e+00> : vector<32x32xf32>
    %31 = tpu.matmul %30, %5, %cst_24 {dimension_numbers = #tpu.dot_dimension_numbers<[1], [0], [0], [1], [0, 0, 1, 1], [], []>} : vector<32x32xf32>, vector<32x32xf32>, vector<32x32xf32> -> vector<32x32xf32>
    %cst_25 = arith.constant dense<0.000000e+00> : vector<32x32xf32>
    %32 = tpu.matmul %1, %31, %cst_25 {dimension_numbers = #tpu.dot_dimension_numbers<[1], [0], [0], [1], [0, 0, 1, 1], [], []>} : vector<32x32xf32>, vector<32x32xf32>, vector<32x32xf32> -> vector<32x32xf32>
    %33 = vector.broadcast %10 : vector<1x32xf32> to vector<32x32xf32>
    %34 = arith.addf %32, %33 : vector<32x32xf32>
    %cst_26 = arith.constant 0.000000e+00 : f32
    %35 = vector.broadcast %cst_26 : f32 to vector<32x32xf32>
    %36 = arith.cmpf ogt, %34, %35 : vector<32x32xf32>
    %cst_27 = arith.constant 0.00999999977 : f32
    %37 = vector.broadcast %cst_27 : f32 to vector<32x32xf32>
    %38 = arith.mulf %37, %34 : vector<32x32xf32>
    %39 = arith.select %36, %34, %38 : vector<32x32xi1>, vector<32x32xf32>
    %cst_28 = arith.constant dense<0.000000e+00> : vector<4x32xf32>
    %40 = tpu.matmul %2, %39, %cst_28 {dimension_numbers = #tpu.dot_dimension_numbers<[1], [0], [0], [1], [0, 0, 1, 1], [], []>} : vector<4x32xf32>, vector<32x32xf32>, vector<4x32xf32> -> vector<4x32xf32>
    %cst_29 = arith.constant dense<0.000000e+00> : vector<4x64xf32>
    %41 = tpu.matmul %40, %6, %cst_29 {dimension_numbers = #tpu.dot_dimension_numbers<[1], [0], [0], [1], [0, 0, 1, 1], [], []>} : vector<4x32xf32>, vector<32x64xf32>, vector<4x64xf32> -> vector<4x64xf32>
    %42 = vector.broadcast %11 : vector<1x64xf32> to vector<4x64xf32>
    %43 = arith.addf %41, %42 : vector<4x64xf32>
    %cst_30 = arith.constant 0.000000e+00 : f32
    %44 = vector.broadcast %cst_30 : f32 to vector<4x64xf32>
    %45 = arith.cmpf ogt, %43, %44 : vector<4x64xf32>
    %cst_31 = arith.constant 0.00999999977 : f32
    %46 = vector.broadcast %cst_31 : f32 to vector<4x64xf32>
    %47 = arith.mulf %46, %43 : vector<4x64xf32>
    %48 = arith.select %45, %43, %47 : vector<4x64xi1>, vector<4x64xf32>
    %cst_32 = arith.constant dense<0.000000e+00> : vector<4x8xf32>
    %49 = tpu.matmul %48, %7, %cst_32 {dimension_numbers = #tpu.dot_dimension_numbers<[1], [0], [0], [1], [0, 0, 1, 1], [], []>} : vector<4x64xf32>, vector<64x8xf32>, vector<4x8xf32> -> vector<4x8xf32>
    %50 = vector.broadcast %12 : vector<1x8xf32> to vector<4x8xf32>
    %51 = arith.addf %49, %50 : vector<4x8xf32>
    %c0_33 = arith.constant 0 : index
    %c0_34 = arith.constant 0 : index
    %52 = vector.load %arg6[%c0_33, %c0_34] : memref<4x8xf32, #tpu.memory_space<vmem>>, vector<4x8xf32>
    tpu.vector_store %arg6[%c0_33, %c0_34], %51 {strides = array<i32>} : memref<4x8xf32, #tpu.memory_space<vmem>>, vector<4x8xf32>,
    return
  }
  func.func @transform_0(%arg0: i32) -> (i32, i32) {
    %c0_i32 = arith.constant 0 : i32
    %c0_i32_0 = arith.constant 0 : i32
    %c0_i32_1 = arith.constant 0 : i32
    return %c0_i32, %c0_i32_0 : i32, i32
  }
  func.func @transform_1(%arg0: i32) -> (i32, i32) {
    %c0_i32 = arith.constant 0 : i32
    %c0_i32_0 = arith.constant 0 : i32
    %c0_i32_1 = arith.constant 0 : i32
    return %c0_i32, %c0_i32_0 : i32, i32
  }
  func.func @transform_2(%arg0: i32) -> (i32, i32) {
    %c0_i32 = arith.constant 0 : i32
    %c0_i32_0 = arith.constant 0 : i32
    %c0_i32_1 = arith.constant 0 : i32
    return %c0_i32, %c0_i32_0 : i32, i32
  }
  func.func @transform_3(%arg0: i32) -> (i32, i32) {
    %c0_i32 = arith.constant 0 : i32
    %c0_i32_0 = arith.constant 0 : i32
    %c0_i32_1 = arith.constant 0 : i32
    return %c0_i32, %c0_i32_0 : i32, i32
  }
  func.func @transform_4(%arg0: i32) -> (i32, i32) {
    %c0_i32 = arith.constant 0 : i32
    %c0_i32_0 = arith.constant 0 : i32
    %c0_i32_1 = arith.constant 0 : i32
    return %c0_i32, %c0_i32_0 : i32, i32
  }
  func.func @transform_5(%arg0: i32) -> (i32, i32) {
    %c0_i32 = arith.constant 0 : i32
    %c0_i32_0 = arith.constant 0 : i32
    %c0_i32_1 = arith.constant 0 : i32
    return %c0_i32, %c0_i32_0 : i32, i32
  }
}

</mosaic_0001>

<bundles_post_ra>
// kernel: feature_selection_head_forward.1
= control target key start
LH: loop header
LB: loop body
LE: loop exit
PB: predicated region body
PF: predicated region fallthrough
CT: control target
= control target key end

     0   :  { %vm56_vm0 = vcmask 64512   ;;  %s1414_s0 = inlined_call_operand.vmem [shape: f32[32,8], index: 0, kind: input, shape index: {}]   ;;  %s1415_s1 = inlined_call_operand.vmem [shape: f32[32,32], index: 1, kind: input, shape index: {}]   ;;  %s1416_s2 = inlined_call_operand.vmem [shape: f32[4,32], index: 2, kind: input, shape index: {}]   ;;  %s1417_s3 = inlined_call_operand.vmem [shape: f32[168,64], index: 3, kind: input, shape index: {}]   ;;  %s1418_s4 = inlined_call_operand.vmem [shape: f32[8,64], index: 4, kind: input, shape index: {}]   ;;  %s1419_s5 = inlined_call_operand.hbm [shape: f32[4,8], index: 5, kind: output, shape index: {}]  }
   0x1   :  { %v30_v0 = vld [vmem:[%s1417_s3] sm:$0xff]  ;;  %v22_v2 = vld [vmem:[%s1414_s0 + $0x8] sm:$0xff]  ;;  %v23_v3 = vld [vmem:[%s1414_s0 + $0x10] sm:$0xff] }
   0x2   :  { %v21_v1 = vld [vmem:[%s1414_s0] sm:$0xff]  ;;  %1007 = vmatprep.subr.mxu1 %v30_v0 }
   0x3   :  { %1009 = vmatprep.mubr.msk.f32.mxu1 %vm56_vm0, %v21_v1 }
   0x4   :  { %10 = vsyncpa [#allocation3], 0  ;;  %1008 = vmatpush3.msra.mxu1 %v30_v0  ;;  %v24_v4 = vld [vmem:[%s1414_s0 + $0x18] sm:$0xff]  ;;  %v1270_v5 = vld [vmem:[%s1415_s1] sm:$0xff]  ;;  %vm158_vm1 = vcmask 261120   ;;  %vm1219_vm10 = vmmov 0  }
   0x5   :  { %1010 = vmatmul.mubr.msk.f32.vlgmr.msra.gmra.mrb[0].mxu1 %vm56_vm0, %v22_v2  ;;  %v1277_v12 = vld [vmem:[%s1415_s1 + $0x8] sm:$0xff]  ;;  %v1282_v13 = vld [vmem:[%s1415_s1 + $0x10] sm:$0xff]  ;;  %v1291_v14 = vld [vmem:[%s1415_s1 + $0x18] sm:$0xff]  ;;  %s1221_s7 = smov [#allocation2]  }
   0x6   :  { %1012 = vmatprep.mubr.msk.f32.mxu1 %vm56_vm0, %v23_v3  ;;  %v31_v15 = vld [vmem:[%s1417_s3 + $0x8] sm:$0xff]  ;;  %v32_v16 = vld [vmem:[%s1417_s3 + $0x10] sm:$0xff]  ;;  %v33_v18 = vld [vmem:[%s1417_s3 + $0x18] sm:$0xff] }
   0x7   :  { %v1134_v17 = vpack.c.bf16 %v32_v16, %v31_v15  ;;  %v34_v19 = vld [vmem:[%s1417_s3 + $0x20] sm:$0xff]  ;;  %v35_v44 = vld [vmem:[%s1417_s3 + $0x28] sm:$0xff]  ;;  %v36_v45 = vld [vmem:[%s1417_s3 + $0x30] sm:$0xff] }
   0x8   :  { %v1138_v20 = vpack.c.bf16 %v34_v19, %v33_v18  ;;  %v915_v21 = vld [vmem:[%s1418_s4] ss:$0 sm:$0xff]  ;;  %v1150_v46 = vpack.c.bf16 %v36_v45, %v35_v44  ;;  %v37_v47 = vld [vmem:[%s1417_s3 + $0x38] sm:$0xff]  ;;  %v924_v50 = vld [vmem:[%s1418_s4 + $0x1] ss:$0 sm:$0xff] }
   0x9   :  { %1013 = vmatmul.mubr.msk.f32.gmra.mrb[2].mxu1 %vm56_vm0, %v24_v4  ;;  %1135 = vmatprep.subr.bf16.mxu0 %v1134_v17  ;;  %v38_v48 = vld [vmem:[%s1417_s3 + $0x40] sm:$0xff]  ;;  %v48_v44 = vld [vmem:[%s1417_s3 + $0x90] sm:$0xff]  ;;  %vm821_vm0 = vcmask 523264  }
   0xa   :  { %1023 = vmatprep.mubr.msk.f32.mxu1 %vm158_vm1, %v1270_v5  ;;  %1137 = vmatpush3.bf16.msra.mxu0 %v1134_v17  ;;  %v1154_v49 = vpack.c.bf16 %v38_v48, %v37_v47  ;;  %v42_v15 = vld [vmem:[%s1417_s3 + $0x60] sm:$0xff]  ;;  %v49_v48 = vld [vmem:[%s1417_s3 + $0x98] sm:$0xff] }
   0xb   :  { %1139 = vmatprep.subr.bf16.mxu0 %v1138_v20  ;;  %v933_v17 = vld [vmem:[%s1418_s4 + $0x2] ss:$0 sm:$0xff] }
   0xe   :  { %1141 = vmatpush3.bf16.msra.mxu0 %v1138_v20 }
   0xf   :  { %1151 = vmatprep.subr.bf16.mxu0 %v1150_v46 }
  0xd8   :  { %v1011_v6 = vpop.f32.mrb[0].mxu1 }
  0xd9   :  { %v135_v7 = vpop.f32.mrb[1].mxu1 }
  0xda   :  { %v1126_v8 = vpack.c.bf16 %v1011_v6, %v135_v7 }
  0xdc   :  { %v1014_v9 = vpop.f32.mrb[2].mxu1  ;;  %1127 = vmatprep.subr.bf16.mxu1 %v1126_v8 }
  0xdd   :  { %v145_v10 = vpop.f32.mrb[3].mxu1  ;;  %1129 = vmatpush3.bf16.msra.mxu1 %v1126_v8 }
  0xde   :  { %v1130_v11 = vpack.c.bf16 %v1014_v9, %v145_v10  ;;  %v1218_v9 = vmov 0.0|0.0   ;;  %v1220_v10 = vmov 0.0  }
  0xe0   :  { %1131 = vmatprep.subr.bf16.mxu1 %v1130_v11 }
  0xe1   :  { %1133 = vmatpush3.bf16.msra.mxu1 %v1130_v11  ;;  %v39_v11 = vld [vmem:[%s1417_s3 + $0x48] sm:$0xff] }
  0xe4   :  { %1024 = vmatmul.mubr.msk.f32.vlgmr.msra.gmra.mrb[4].mxu1 %vm158_vm1, %v1277_v12 }
  0xe5   :  { %1026 = vmatprep.mubr.msk.f32.mxu1 %vm158_vm1, %v1282_v13 }
  0xe8   :  { %1027 = vmatmul.mubr.msk.f32.gmra.mrb[6].mxu1 %vm158_vm1, %v1291_v14 }
  0xe9   :  { %1051 = vmatprep.mubr.msk.f32.mxu1 %vm158_vm1, %v1270_v5 }
 0x1b7   :  { %v1025_v22 = vpop.f32.mrb[4].mxu1 }
 0x1b8   :  { %v243_v23 = vadd.f32 %v1025_v22, %v915_v21  ;;  %v237_v24 = vpop.f32.mrb[5].mxu1 }
 0x1b9   :  { %v238_v25 = vadd.f32 %v915_v21, %v237_v24 }
 0x1ba   :  { %v261_v26 = vmul.f32 0.01, %v243_v23  ;;  %vm257_vm2 = vcmp.gt.f32.partialorder %v243_v23, 0.0 }
 0x1bb   :  { %v1028_v27 = vpop.f32.mrb[6].mxu1  ;;  %vm256_vm3 = vcmp.gt.f32.partialorder %v238_v25, 0.0  ;;  %v260_v28 = vmul.f32 0.01, %v238_v25 }
 0x1bc   :  { %v253_v29 = vadd.f32 %v1028_v27, %v915_v21  ;;  %v247_v30 = vpop.f32.mrb[7].mxu1  ;;  %v265_v34 = vsel %vm257_vm2, %v243_v23, %v261_v26 }
 0x1bd   :  { %v248_v31 = vadd.f32 %v915_v21, %v247_v30  ;;  %v264_v32 = vsel %vm256_vm3, %v238_v25, %v260_v28 }
 0x1be   :  { %v263_v33 = vmul.f32 0.01, %v253_v29  ;;  %1037 = vmatprep.mubr.msk.f32.mxu0 %vm158_vm1, %v264_v32  ;;  %vm259_vm4 = vcmp.gt.f32.partialorder %v253_v29, 0.0 }
 0x1bf   :  { %vm258_vm5 = vcmp.gt.f32.partialorder %v248_v31, 0.0  ;;  %v262_v35 = vmul.f32 0.01, %v248_v31  ;;  %1038 = vmatmul.mubr.msk.f32.vlgmr.msra.gmra.mrb[0].mxu0 %vm158_vm1, %v265_v34 }
 0x1c0   :  { %v267_v37 = vsel %vm259_vm4, %v253_v29, %v263_v33  ;;  %1153 = vmatpush3.bf16.msra.mxu0 %v1150_v46 }
 0x1c1   :  { %v266_v36 = vsel %vm258_vm5, %v248_v31, %v262_v35  ;;  %1155 = vmatprep.subr.bf16.mxu0 %v1154_v49 }
 0x1c2   :  { %1040 = vmatprep.mubr.msk.f32.mxu0 %vm158_vm1, %v266_v36  ;;  %v29_v36 = vld [vmem:[%s1416_s2] sm:$0xf] }
 0x1c3   :  { %1041 = vmatmul.mubr.msk.f32.gmra.mrb[2].mxu0 %vm158_vm1, %v267_v37  ;;  %v43_v37 = vld [vmem:[%s1417_s3 + $0x68] sm:$0xff] }
 0x1c4   :  { %1157 = vmatpush3.bf16.msra.mxu0 %v1154_v49  ;;  %v50_v49 = vld [vmem:[%s1417_s3 + $0xa0] sm:$0xff] }
 0x1c5   :  { %1166 = vmatprep.subr.bf16.mxu0 %v1218_v9 }
 0x292   :  { %v1039_v38 = vpop.f32.mrb[0].mxu0 }
 0x293   :  { %v346_v39 = vpop.f32.mrb[1].mxu0 }
 0x294   :  { %v1142_v40 = vpack.c.bf16 %v1039_v38, %v346_v39  ;;  %v44_v38 = vld [vmem:[%s1417_s3 + $0x70] sm:$0xff]  ;;  %v45_v39 = vld [vmem:[%s1417_s3 + $0x78] sm:$0xff] }
 0x296   :  { %v1042_v41 = vpop.f32.mrb[2].mxu0  ;;  %1143 = vmatprep.subr.bf16.mxu1 %v1142_v40 }
 0x297   :  { %v356_v42 = vpop.f32.mrb[3].mxu0  ;;  %1145 = vmatpush3.bf16.msra.mxu1 %v1142_v40  ;;  %v1179_v40 = vpack.c.bf16 %v44_v38, %v43_v37 }
 0x298   :  { %v1146_v43 = vpack.c.bf16 %v1042_v41, %v356_v42  ;;  %v46_v41 = vld [vmem:[%s1417_s3 + $0x80] sm:$0xff] }
 0x299   :  { %v1182_v42 = vpack.c.bf16 %v46_v41, %v45_v39 }
 0x29a   :  { %1147 = vmatprep.subr.bf16.mxu1 %v1146_v43 }
 0x29b   :  { %1149 = vmatpush3.bf16.msra.mxu1 %v1146_v43  ;;  %v47_v43 = vld [vmem:[%s1417_s3 + $0x88] sm:$0xff] }
 0x29c   :  { %v1185_v45 = vpack.c.bf16 %v48_v44, %v47_v43 }
 0x29e   :  { %1052 = vmatmul.mubr.msk.f32.vlgmr.msra.gmra.mrb[8].mxu1 %vm158_vm1, %v1277_v12 }
 0x29f   :  { %1054 = vmatprep.mubr.msk.f32.mxu1 %vm158_vm1, %v1282_v13 }
 0x2a2   :  { %1055 = vmatmul.mubr.msk.f32.gmra.mrb[10].mxu1 %vm158_vm1, %v1291_v14 }
 0x2a3   :  { %1079 = vmatprep.mubr.msk.f32.mxu1 %vm158_vm1, %v1270_v5 }
 0x371   :  { %v1053_v51 = vpop.f32.mrb[8].mxu1 }
 0x372   :  { %v441_v52 = vadd.f32 %v1053_v51, %v924_v50  ;;  %v435_v53 = vpop.f32.mrb[9].mxu1  ;;  %v939_v51 = vld [vmem:[%s1418_s4 + $0x3] ss:$0 sm:$0xff] }
 0x373   :  { %v436_v54 = vadd.f32 %v924_v50, %v435_v53 }
 0x374   :  { %v459_v55 = vmul.f32 0.01, %v441_v52  ;;  %vm455_vm6 = vcmp.gt.f32.partialorder %v441_v52, 0.0 }
 0x375   :  { %vm454_vm7 = vcmp.gt.f32.partialorder %v436_v54, 0.0  ;;  %v458_v56 = vmul.f32 0.01, %v436_v54  ;;  %v1056_v57 = vpop.f32.mrb[10].mxu1 }
 0x376   :  { %v451_v58 = vadd.f32 %v1056_v57, %v924_v50  ;;  %v445_v59 = vpop.f32.mrb[11].mxu1  ;;  %v463_v62 = vsel %vm455_vm6, %v441_v52, %v459_v55  ;;  %v941_v57 = vld [vmem:[%s1418_s4 + $0x4] ss:$0 sm:$0xff] }
 0x377   :  { %v446_v60 = vadd.f32 %v924_v50, %v445_v59  ;;  %v462_v61 = vsel %vm454_vm7, %v436_v54, %v458_v56  ;;  %v1188_v50 = vpack.c.bf16 %v50_v49, %v49_v48 }
 0x378   :  { %v461_v63 = vmul.f32 0.01, %v451_v58  ;;  %1065 = vmatprep.mubr.msk.f32.mxu0 %vm158_vm1, %v462_v61  ;;  %vm457_vm8 = vcmp.gt.f32.partialorder %v451_v58, 0.0 }
 0x379   :  { %vm456_vm9 = vcmp.gt.f32.partialorder %v446_v60, 0.0  ;;  %v460_v0 = vmul.f32 0.01, %v446_v60  ;;  %1066 = vmatmul.mubr.msk.f32.vlgmr.msra.gmra.mrb[4].mxu0 %vm158_vm1, %v463_v62 }
 0x37a   :  { %v465_v2 = vsel %vm457_vm8, %v451_v58, %v461_v63 }
 0x37b   :  { %v464_v1 = vsel %vm456_vm9, %v446_v60, %v460_v0 }
 0x37c   :  { %1068 = vmatprep.mubr.msk.f32.mxu0 %vm158_vm1, %v464_v1 }
 0x37d   :  { %1069 = vmatmul.mubr.msk.f32.gmra.mrb[6].mxu0 %vm158_vm1, %v465_v2 }
 0x37e   :  { %1093 = vmatprep.mubr.msk.f32.mxu0 %vm1219_vm10, %v1220_v10 }
 0x44c   :  { %v1067_v3 = vpop.f32.mrb[4].mxu0 }
 0x44d   :  { %v544_v4 = vpop.f32.mrb[5].mxu0 }
 0x44e   :  { %v1158_v5 = vpack.c.bf16 %v1067_v3, %v544_v4 }
 0x450   :  { %v1070_v6 = vpop.f32.mrb[6].mxu0  ;;  %1159 = vmatprep.subr.bf16.mxu1 %v1158_v5 }
 0x451   :  { %v554_v7 = vpop.f32.mrb[7].mxu0  ;;  %1161 = vmatpush3.bf16.msra.mxu1 %v1158_v5 }
 0x452   :  { %v1162_v8 = vpack.c.bf16 %v1070_v6, %v554_v7 }
 0x454   :  { %1163 = vmatprep.subr.bf16.mxu1 %v1162_v8 }
 0x455   :  { %1165 = vmatpush3.bf16.msra.mxu1 %v1162_v8 }
 0x456   :  { %1172 = vmatprep.subr.bf16.mxu1 %v1218_v9 }
 0x458   :  { %1080 = vmatmul.mubr.msk.f32.vlgmr.msra.gmra.mrb[12].mxu1 %vm158_vm1, %v1277_v12  ;;  %v40_v12 = vld [vmem:[%s1417_s3 + $0x50] sm:$0xff] }
 0x459   :  { %1082 = vmatprep.mubr.msk.f32.mxu1 %vm158_vm1, %v1282_v13  ;;  %v41_v13 = vld [vmem:[%s1417_s3 + $0x58] sm:$0xff]  ;;  %s903_s3 = sshll.u32 %s1221_s7, 4  ;;  %s904_s3 = int_to_ptr.vmem [resolvable:$true] %s903_s3 }
 0x45a   :  { %v1176_v16 = vpack.c.bf16 %v42_v15, %v41_v13  ;;  %s1194_s8 = scalar_lea.vmem %s904_s3, 64  ;;  %p1199_p1 = scmp.lt.s32.totalorder %s904_s3, %s904_s3 }
 0x45b   :  { %p1195_p0 = scmp.ne.s32.totalorder %s904_s3, %s1194_s8  ;;  %p1200_p2 = scmp.lt.s32.totalorder %s1194_s8, %s1194_s8 }
 0x45c   :  { %1083 = vmatmul.mubr.msk.f32.gmra.mrb[14].mxu1 %vm158_vm1, %v1291_v14  ;;  %v1173_v14 = vpack.c.bf16 %v40_v12, %v39_v11 }
 0x45d   :  { %1104 = vmatprep.mubr.msk.f32.mxu1 %vm1219_vm10, %v1220_v10  ;;  %p1201_p3 = por %p1200_p2, %p1199_p1 }
 0x45e   :  { %1174 = vmatpush3.bf16.msra.mxu1 %v1173_v14 }
 0x45f   :  { %1175 = vmatprep.subr.bf16.mxu1 %v1218_v9  ;;  %p1202_p4 = pnand %p1201_p3, %p1195_p0 }
 0x462   :  { %1177 = vmatpush3.bf16.msra.mxu1 %v1176_v16 }
 0x52b   :  { %v1081_v18 = vpop.f32.mrb[12].mxu1 }
 0x52c   :  { %v639_v19 = vadd.f32 %v1081_v18, %v933_v17  ;;  %v633_v20 = vpop.f32.mrb[13].mxu1 }
 0x52d   :  { %v634_v21 = vadd.f32 %v933_v17, %v633_v20 }
 0x52e   :  { %vm653_vm11 = vcmp.gt.f32.partialorder %v639_v19, 0.0  ;;  %v657_v22 = vmul.f32 0.01, %v639_v19 }
 0x52f   :  { %vm652_vm12 = vcmp.gt.f32.partialorder %v634_v21, 0.0  ;;  %v656_v23 = vmul.f32 0.01, %v634_v21  ;;  %v1084_v24 = vpop.f32.mrb[14].mxu1 }
 0x530   :  { %v661_v25 = vsel %vm653_vm11, %v639_v19, %v657_v22  ;;  %v649_v26 = vadd.f32 %v1084_v24, %v933_v17  ;;  %v643_v27 = vpop.f32.mrb[15].mxu1 }
 0x531   :  { %v660_v28 = vsel %vm652_vm12, %v634_v21, %v656_v23  ;;  %v644_v29 = vadd.f32 %v933_v17, %v643_v27 }
 0x532   :  { %v1167_v30 = vpack.c.bf16 %v661_v25, %v660_v28  ;;  %vm655_vm13 = vcmp.gt.f32.partialorder %v649_v26, 0.0  ;;  %v659_v31 = vmul.f32 0.01, %v649_v26 }
 0x533   :  { %vm654_vm14 = vcmp.gt.f32.partialorder %v644_v29, 0.0  ;;  %v658_v32 = vmul.f32 0.01, %v644_v29 }
 0x534   :  { %v663_v33 = vsel %vm655_vm13, %v649_v26, %v659_v31  ;;  %1168 = vmatpush3.bf16.msra.mxu0 %v1167_v30 }
 0x535   :  { %v662_v34 = vsel %vm654_vm14, %v644_v29, %v658_v32  ;;  %1169 = vmatprep.subr.bf16.mxu0 %v1218_v9 }
 0x536   :  { %v1170_v35 = vpack.c.bf16 %v663_v33, %v662_v34 }
 0x538   :  { %1171 = vmatpush3.bf16.msra.mxu0 %v1170_v35 }
 0x539   :  { %1178 = vmatprep.subr.bf16.mxu0 %v1218_v9 }
 0x53b   :  { %1094 = vmatmul.mubr.msk.f32.vlgmr.msra.gmra.mrb[8].mxu0 %vm158_vm1, %v29_v36 }
 0x53c   :  { %1123 = vmatprep.mubr.msk.f32.mxu0 %vm1219_vm10, %v1220_v10  ;;  %1180 = vmatpush3.bf16.msra.mxu0 %v1179_v40 }
 0x53d   :  { %1181 = vmatprep.subr.bf16.mxu0 %v1218_v9 }
 0x540   :  { %1183 = vmatpush3.bf16.msra.mxu0 %v1182_v42 }
 0x541   :  { %1184 = vmatprep.subr.bf16.mxu0 %v1218_v9 }
 0x544   :  { %1186 = vmatpush3.bf16.msra.mxu0 %v1185_v45 }
 0x545   :  { %1187 = vmatprep.subr.bf16.mxu0 %v1218_v9 }
 0x548   :  { %1189 = vmatpush3.bf16.msra.mxu0 %v1188_v50 }
 0x60e   :  { %v733_v46 = vpop.f32.mrb[8].mxu0 }
 0x60f   :  { %v1095_v47 = vpop.f32.mrb[9].mxu0  ;;  %1105 = vmatmul.mubr.msk.f32.vlgmr.msra.gmra.mrb[16].mxu1 %vm158_vm1, %v733_v46  ;;  %vm895_vm1 = vcmask 60416  }
 0x6e2   :  { %v810_v52 = vpop.f32.mrb[16].mxu1 }
 0x6e3   :  { %v811_v53 = vadd.f32 %v939_v51, %v810_v52  ;;  %v1106_v54 = vpop.f32.mrb[17].mxu1 }
 0x6e5   :  { %vm814_vm15 = vcmp.gt.f32.partialorder %v811_v53, 0.0  ;;  %v815_v55 = vmul.f32 0.01, %v811_v53 }
 0x6e7   :  { %v816_v56 = vsel %vm814_vm15, %v811_v53, %v815_v55 }
 0x6e8   :  { %1124 = vmatmul.mubr.msk.f32.vlgmr.msra.gmra.mrb[10].mxu0 %vm821_vm0, %v816_v56 }
 0x7bb   :  { %v891_v58 = vpop.f32.mrb[10].mxu0 }
 0x7bc   :  { %v892_v59 = vadd.f32 %v941_v57, %v891_v58  ;;  %v1125_v60 = vpop.f32.mrb[11].mxu0 }
 0x7be   :  { %896 = vst.msk [vmem:[#allocation2] sm:$0xf] %vm895_vm1, %v892_v59 }
 0x7bf   :  { %1205 = shalt.err (!%p1202_p4)
}
 0x7c0   :  { %s1206_s11 = scalar_lea.hbm %s1419_s5, 64 }
 0x7c1   :  { %p1207_p5 = scmp.ne.s32.totalorder %s1419_s5, %s1206_s11  ;;  %p1210_p6 = scmp.lt.u32.totalorder %s1206_s11, %s1419_s5 }
 0x7c3   :  { %p1212_p7 = pnand %p1210_p6, %p1207_p5 }
 0x7c5   :  { %1215 = shalt.err (!%p1212_p7)
}
 0x7c6   :  { %906 = dma.vmem_to_hbm [thread:$0]  %s904_s3, 64, %s1419_s5, [#allocation3]  }
 0x7c7   :  { %1216 = dma.done.wait [#allocation3], 64  }
 0x7c8   :  { %1217 = vsyncadd [#allocation3], 4294967232 }
 0x7c9   :  { %910 = vsyncpa [#allocation3], 1 }

</bundles_post_ra>
